<compile_context>
chip_gen: v7x
topology: tpu7x:2x2x1
jax: 0.10.0
libtpu: 0.0.40
codegen_flags: <defaults>
</compile_context>

<pallas_src>
import functools
import math

import jax
import jax.numpy as jnp
from jax.experimental import pallas as pl
from jax.experimental.pallas import tpu as pltpu


def _round_up(a, m):
    return (a + m - 1) // m * m


def _choose_tm(m, tm_target):
    """Balanced row-tile size; >=2 (even #) tiles when possible (v7x megacore)."""
    if m <= 8:
        return 8
    n_tiles = max(2, pl.cdiv(m, tm_target))
    if n_tiles % 2:
        n_tiles += 1
    return _round_up(pl.cdiv(m, n_tiles), 8)


def _fused_head_kernel(x_ref, w_ref, b_ref, mu_ref, ls_ref, lp_ref, *,
                       n, compute_dtype):
    """One fused Linear for all three heads, split into three outputs.

    x: (TM, K) f32      -> cast to compute_dtype in-register (VPU, ~free)
    w: (K, 3N) compute_dtype (VMEM resident)
    b: (1, 3N) f32
    mu/ls/lp: (TM, N)
    """
    x = x_ref[...].astype(compute_dtype)
    acc = jnp.dot(x, w_ref[...], preferred_element_type=jnp.float32) + b_ref[...]
    mu_ref[...] = acc[:, 0 * n:1 * n].astype(mu_ref.dtype)
    ls_ref[...] = acc[:, 1 * n:2 * n].astype(ls_ref.dtype)
    lp_ref[...] = acc[:, 2 * n:3 * n].astype(lp_ref.dtype)


def init_params(key, in_dim, out_dim, n_mixtures):
    """float32 master parameters, mimicking nn.Linear default init
    (uniform +-1/sqrt(in_dim)); weights already transposed to (in_dim, N)."""
    n_out = out_dim * n_mixtures
    bound = 1.0 / math.sqrt(in_dim)
    keys = jax.random.split(key, 6)

    def w(k):
        return jax.random.uniform(k, (in_dim, n_out), jnp.float32, -bound, bound)

    def b(k):
        return jax.random.uniform(k, (1, n_out), jnp.float32, -bound, bound)

    return dict(
        w_mu=w(keys[0]), b_mu=b(keys[1]),
        w_ls=w(keys[2]), b_ls=b(keys[3]),
        w_lp=w(keys[4]), b_lp=b(keys[5]),
    )


def fuse_params(params, compute_dtype=jnp.bfloat16):
    """Concatenate + cast the three heads ONCE (outside the per-step forward),
    so each call reads a single prefused (K, 3N) weight with no per-call
    concat/cast pass.  Pass compute_dtype=jnp.float32 for a full-precision
    escape hatch."""
    w = jnp.concatenate([params["w_mu"], params["w_ls"], params["w_lp"]],
                        axis=1).astype(compute_dtype)
    b = jnp.concatenate([params["b_mu"], params["b_ls"], params["b_lp"]],
                        axis=1).astype(jnp.float32)
    return dict(w=w, b=b)


def discrete_log_head(x, fused, out_dim, n_mixtures, *,
                      tm_target=512, out_dtype=jnp.float32):
    """Forward pass of _DiscreteLogHead (const_var=False, n_mixtures > 1).

    tm_target: 512 is the v5e/v6e sweet spot (>=85% of the HBM roofline at
    tile 512); sweep up to 1024 on v6e when K*3N is small, keep <=512 on v7x
    (64 MiB VMEM per TC).
    """
    lead = x.shape[:-1]
    K = x.shape[-1]
    M = int(math.prod(lead))
    N = out_dim * n_mixtures
    N3 = 3 * N

    w, b = fused["w"], fused["b"]
    assert w.shape == (K, N3) and b.shape == (1, N3)
    compute_dtype = w.dtype

    x2 = x.reshape(M, K)                 # no dtype cast here (done in-kernel)

    tm = _choose_tm(M, tm_target)
    grid = (pl.cdiv(M, tm),)             # partial last block masked by Pallas

    out_isz = jnp.dtype(out_dtype).itemsize
    w_bytes = K * N3 * jnp.dtype(compute_dtype).itemsize

    # Large resident weight: one buffer is enough (constant index map).
    big_weight = w_bytes > (4 << 20)
    w_spec_kw = dict(pipeline_mode=pl.Buffered(1)) if big_weight else {}
    w_spec = pl.BlockSpec((K, N3), lambda i: (0, 0), **w_spec_kw)

    # Explicit VMEM budget (v5e scoped default is 16 MiB; v7x has 64 MiB/TC).
    vmem_bytes = (2 * tm * K * x.dtype.itemsize          # x tiles, double-buffered
                  + (1 if big_weight else 2) * w_bytes   # resident fused weight
                  + 2 * N3 * 4                           # bias
                  + 2 * 3 * tm * N * out_isz)            # output tiles
    vmem_limit = None
    if vmem_bytes > (12 << 20):
        vmem_limit = min(int(vmem_bytes * 1.5) + (2 << 20), 64 << 20)

    cost = pl.CostEstimate(
        flops=2 * M * K * N3,
        transcendentals=0,
        bytes_accessed=(M * K * x.dtype.itemsize
                        + w_bytes + N3 * 4
                        + 3 * M * N * out_isz),
    )

    kernel = functools.partial(_fused_head_kernel, n=N,
                               compute_dtype=compute_dtype)

    out_sds = jax.ShapeDtypeStruct((M, N), out_dtype)
    out_spec = pl.BlockSpec((tm, N), lambda i: (i, 0))

    mu, ln_scale, logit_prob = pl.pallas_call(
        kernel,
        grid=grid,
        in_specs=[
            pl.BlockSpec((tm, K), lambda i: (i, 0)),   # x tile, pipelined
            w_spec,                                    # fused W, VMEM resident
            pl.BlockSpec((1, N3), lambda i: (0, 0)),   # fused bias, resident
        ],
        out_specs=[out_spec, out_spec, out_spec],
        out_shape=[out_sds, out_sds, out_sds],
        compiler_params=pltpu.CompilerParams(
            dimension_semantics=("parallel",),         # shards across v7x TCs
            vmem_limit_bytes=vmem_limit,
        ),
        cost_estimate=cost,
    )(x2, w, b)
    # If a profile still shows exposed DMA on the x/out streams, add
    # pipeline_mode=pl.Buffered(3) to the x in_spec / out_specs and sweep.

    dist_shape = lead + (out_dim, n_mixtures)
    return (mu.reshape(dist_shape),
            ln_scale.reshape(dist_shape),
            logit_prob.reshape(dist_shape))
    # TODO(synk): const_var=True (learned per-out_dim scalar broadcast) and
    # n_mixtures == 1 (logit_prob = ones_like(mu)) branches are parameter
    # broadcasts / constants with no kernel hot path; not emitted here.


def discrete_log_head_ref(x, params, out_dim, n_mixtures):
    """Pure-JAX float32 reference for correctness checking."""
    dist_shape = x.shape[:-1] + (out_dim, n_mixtures)
    mu = (x @ params["w_mu"] + params["b_mu"][0]).reshape(dist_shape)
    ls = (x @ params["w_ls"] + params["b_ls"][0]).reshape(dist_shape)
    lp = (x @ params["w_lp"] + params["b_lp"][0]).reshape(dist_shape)
    return mu, ls, lp


if __name__ == "__main__":
    B, T = 2, 8          # leading dims of x (x.shape[:-1])
    in_dim = 32
    out_dim = 4
    n_mixtures = 3

    key = jax.random.PRNGKey(0)
    k_x, k_p = jax.random.split(key)
    x = jax.random.normal(k_x, (B, T, in_dim), dtype=jnp.float32)

    params = init_params(k_p, in_dim, out_dim, n_mixtures)
    fused = fuse_params(params)          # once, outside the per-step forward

    fwd = jax.jit(functools.partial(discrete_log_head,
                                    out_dim=out_dim, n_mixtures=n_mixtures))
    mu, ln_scale, logit_prob = fwd(x, fused)
    jax.block_until_ready((mu, ln_scale, logit_prob))

    mu_r, ls_r, lp_r = discrete_log_head_ref(x, params, out_dim, n_mixtures)
    assert mu.shape == (B, T, out_dim, n_mixtures)
    assert ln_scale.shape == (B, T, out_dim, n_mixtures)
    assert logit_prob.shape == (B, T, out_dim, n_mixtures)
    # bf16 operands with f32 accumulation: allow bf16-level tolerance vs f32 ref.
    assert jnp.allclose(mu, mu_r, atol=3e-2, rtol=3e-2)
    assert jnp.allclose(ln_scale, ls_r, atol=3e-2, rtol=3e-2)
    assert jnp.allclose(logit_prob, lp_r, atol=3e-2, rtol=3e-2)

    print("KERNEL_OK")
</pallas_src>

<mosaic_0001>
module attributes {stable_mosaic.version = 11 : i64} {
  func.func @_fused_head_kernel(%arg0: i32, %arg1: memref<8x32xf32, #tpu.memory_space<vmem>>, %arg2: memref<32x36xbf16, #tpu.memory_space<vmem>>, %arg3: memref<1x36xf32, #tpu.memory_space<vmem>>, %arg4: memref<8x12xf32, #tpu.memory_space<vmem>>, %arg5: memref<8x12xf32, #tpu.memory_space<vmem>>, %arg6: memref<8x12xf32, #tpu.memory_space<vmem>>) attributes {dimension_semantics = [#tpu.dimension_semantics<parallel>], iteration_bounds = array<i64: 2>, scalar_prefetch = 0 : i64, scratch_operands = 0 : i64, tpu.core_type = #tpu.core_type<tc>, window_params = [{transform_indices = @transform_0, window_bounds = array<i64: 8, 32>}, {pipeline_mode = #tpu.pipeline_mode<synchronous>, transform_indices = @transform_1, window_bounds = array<i64: 32, 36>}, {pipeline_mode = #tpu.pipeline_mode<synchronous>, transform_indices = @transform_2, window_bounds = array<i64: 1, 36>}, {transform_indices = @transform_3, window_bounds = array<i64: 8, 12>}, {transform_indices = @transform_4, window_bounds = array<i64: 8, 12>}, {transform_indices = @transform_5, window_bounds = array<i64: 8, 12>}]} {
    %c0 = arith.constant 0 : index
    %c0_0 = arith.constant 0 : index
    %0 = vector.load %arg1[%c0, %c0_0] : memref<8x32xf32, #tpu.memory_space<vmem>>, vector<8x32xf32>
    %1 = arith.truncf %0 : vector<8x32xf32> to vector<8x32xbf16>
    %c0_1 = arith.constant 0 : index
    %c0_2 = arith.constant 0 : index
    %2 = vector.load %arg2[%c0_1, %c0_2] : memref<32x36xbf16, #tpu.memory_space<vmem>>, vector<32x36xbf16>
    %cst = arith.constant dense<0.000000e+00> : vector<8x36xf32>
    %3 = tpu.matmul %1, %2, %cst {dimension_numbers = #tpu.dot_dimension_numbers<[1], [0], [0], [1], [0, 0, 1, 1], [], []>} : vector<8x32xbf16>, vector<32x36xbf16>, vector<8x36xf32> -> vector<8x36xf32>
    %c0_3 = arith.constant 0 : index
    %c0_4 = arith.constant 0 : index
    %4 = vector.load %arg3[%c0_3, %c0_4] : memref<1x36xf32, #tpu.memory_space<vmem>>, vector<1x36xf32>
    %5 = vector.broadcast %4 : vector<1x36xf32> to vector<8x36xf32>
    %6 = arith.addf %3, %5 : vector<8x36xf32>
    %7 = vector.extract_strided_slice %6 {offsets = [0, 0], sizes = [8, 12], strides = [1, 1]} : vector<8x36xf32> to vector<8x12xf32>
    %c0_5 = arith.constant 0 : index
    %c0_6 = arith.constant 0 : index
    %8 = vector.load %arg4[%c0_5, %c0_6] : memref<8x12xf32, #tpu.memory_space<vmem>>, vector<8x12xf32>
    tpu.vector_store %arg4[%c0_5, %c0_6], %7 {strides = array<i32>} : memref<8x12xf32, #tpu.memory_space<vmem>>, vector<8x12xf32>,
    %9 = vector.extract_strided_slice %6 {offsets = [0, 12], sizes = [8, 12], strides = [1, 1]} : vector<8x36xf32> to vector<8x12xf32>
    %c0_7 = arith.constant 0 : index
    %c0_8 = arith.constant 0 : index
    %10 = vector.load %arg5[%c0_7, %c0_8] : memref<8x12xf32, #tpu.memory_space<vmem>>, vector<8x12xf32>
    tpu.vector_store %arg5[%c0_7, %c0_8], %9 {strides = array<i32>} : memref<8x12xf32, #tpu.memory_space<vmem>>, vector<8x12xf32>,
    %11 = vector.extract_strided_slice %6 {offsets = [0, 24], sizes = [8, 12], strides = [1, 1]} : vector<8x36xf32> to vector<8x12xf32>
    %c0_9 = arith.constant 0 : index
    %c0_10 = arith.constant 0 : index
    %12 = vector.load %arg6[%c0_9, %c0_10] : memref<8x12xf32, #tpu.memory_space<vmem>>, vector<8x12xf32>
    tpu.vector_store %arg6[%c0_9, %c0_10], %11 {strides = array<i32>} : memref<8x12xf32, #tpu.memory_space<vmem>>, vector<8x12xf32>,
    return
  }
  func.func @transform_0(%arg0: i32) -> (i32, i32) {
    %c0_i32 = arith.constant 0 : i32
    %c0_i32_0 = arith.constant 0 : i32
    return %arg0, %c0_i32 : i32, i32
  }
  func.func @transform_1(%arg0: i32) -> (i32, i32) {
    %c0_i32 = arith.constant 0 : i32
    %c0_i32_0 = arith.constant 0 : i32
    %c0_i32_1 = arith.constant 0 : i32
    return %c0_i32, %c0_i32_0 : i32, i32
  }
  func.func @transform_2(%arg0: i32) -> (i32, i32) {
    %c0_i32 = arith.constant 0 : i32
    %c0_i32_0 = arith.constant 0 : i32
    %c0_i32_1 = arith.constant 0 : i32
    return %c0_i32, %c0_i32_0 : i32, i32
  }
  func.func @transform_3(%arg0: i32) -> (i32, i32) {
    %c0_i32 = arith.constant 0 : i32
    %c0_i32_0 = arith.constant 0 : i32
    return %arg0, %c0_i32 : i32, i32
  }
  func.func @transform_4(%arg0: i32) -> (i32, i32) {
    %c0_i32 = arith.constant 0 : i32
    %c0_i32_0 = arith.constant 0 : i32
    return %arg0, %c0_i32 : i32, i32
  }
  func.func @transform_5(%arg0: i32) -> (i32, i32) {
    %c0_i32 = arith.constant 0 : i32
    %c0_i32_0 = arith.constant 0 : i32
    return %arg0, %c0_i32 : i32, i32
  }
}

</mosaic_0001>

<bundles_post_ra>
// kernel: discrete_log_head.1
= control target key start
LH: loop header
LB: loop body
LE: loop exit
PB: predicated region body
PF: predicated region fallthrough
CT: control target
= control target key end

     0   :  { %11 = vsyncpa [#allocation3], 0  ;;  %s865_s0 = inlined_call_operand.hbm [shape: f32[16,32], index: 0, kind: input, shape index: {}]   ;;  %s866_s1 = inlined_call_operand.hbm [shape: bf16[32,36], index: 1, kind: input, shape index: {}]   ;;  %s867_s2 = inlined_call_operand.vmem [shape: f32[1,36], index: 2, kind: input, shape index: {}]   ;;  %s868_s3 = inlined_call_operand.vmem [shape: f32[16,12], index: 3, kind: output, shape index: {0}]   ;;  %s869_s4 = inlined_call_operand.vmem [shape: f32[16,12], index: 4, kind: output, shape index: {1}]   ;;  %s870_s5 = inlined_call_operand.vmem [shape: f32[16,12], index: 5, kind: output, shape index: {2}]  }
   0x1   :  { %13 = vsyncpa [#allocation3 + $0x1], 0 }
   0x2   :  { %14 = vsyncpa [#allocation5], 0  ;;  %s717_s18 = smov 0   ;;  %s719_s19 = smov 0  }
   0x3   :  { %s721_s20 = smov 0   ;;  %s723_s21 = smov 0  }
   0x4 LB: > { %s736_s22 = sadd.s32 4294967295, %s677_s21   ;;  %p40_p0 = scmp.ne.s32.totalorder %s669_s19, %s665_s18  ;;  %s677_s21 = sphi %s723_s21, %s886_s21   ;;  %s673_s20 = sphi %s721_s20, %s885_s20   ;;  %s669_s19 = sphi %s719_s19, %s884_s19   ;;  %s665_s18 = sphi %s717_s18, %s883_s18  }
   0x5   : > { %p871_p1 = scmp.eq.s32.totalorder %s736_s22, 0  ;;  %p495_p2 = scmp.ge.s32.totalorder %s677_s21, 1 }
   0x6   : > { %p171_p3 = scmp.lt.s32.totalorder %s677_s21, 3  ;;  %s679_s25 = smov [#allocation4]  }
   0x7   : > { %p744_p4 = por %p871_p1, %p40_p0  ;;  %s183_s26 = sshll.u32 %s679_s25, 4  ;;  %s184_s26 = int_to_ptr.vmem [resolvable:$true] %s183_s26 }
   0x8   : > { %p748_p5 = pnand %p495_p2, %p171_p3  ;;  %s761_s28 = sadd.s32 1, %s677_s21  }
   0x9   : > { %s874_s23 = scalar_select %p744_p4, 1, 0 }
   0xa   : > { %s875_s24 = scalar_select %p748_p5, 1, 0 }
   0xb   : > { %p529_p6 = pneg %p748_p5  ;;  %s27_s29 = sadd.s32 1, %s673_s20 }
   0xc   : > { %s24_s30 = ssub.s32 %s677_s21, %s761_s28  ;;  %s581_s8 = scalar_lea.hbm %s866_s1, 256 }
   0xd   : > { %p756_p7 = pnand %p529_p6, %p871_p1  ;;  %p582_p8 = scmp.ne.s32.totalorder %s866_s1, %s581_s8 }
   0xe   : > { %p588_p12 = scmp.lt.u32.totalorder %s581_s8, %s866_s1 }
   0xf   : > { %p583_p9 = pneg %p756_p7 }
  0x11   : > { %p584_p10 = pnand %p583_p9, %p582_p8 }
  0x13   : > { %p585_p11 = pneg %p584_p10 }
  0x15   : > { %p590_p13 = pnand %p588_p12, %p585_p11 }
  0x17   : > { %593 = shalt.err (!%p590_p13)
}
  0x18   : > { %s594_s13 = scalar_lea.vmem %s184_s26, 256  ;;  %p602_p6 = scmp.lt.s32.totalorder %s184_s26, %s184_s26 }
  0x19   : > { %p595_p0 = scmp.ne.s32.totalorder %s184_s26, %s594_s13  ;;  %p603_p1 = scmp.lt.s32.totalorder %s594_s13, %s594_s13 }
  0x1b   : > { %p597_p2 = pnand %p595_p0, %p583_p9  ;;  %p604_p4 = por %p603_p1, %p602_p6 }
  0x1d   : > { %p598_p3 = pneg %p597_p2 }
  0x1f   : > { %p605_p5 = pnand %p604_p4, %p598_p3 }
  0x21   : > { %608 = shalt.err (!%p605_p5)
}
  0x22   : > { %s680_s14 = smov 64   ;;  %s681_s15 = smov 4  }
  0x23   : > { %532 = dma.hbm_to_vmem [thread:$0]  (!%p756_p7), %s866_s1, 256, %s184_s26, [#allocation5], %s680_s14, %s680_s14, %s681_s15  }
  0x24   : > { %p25_p8 = scmp.eq.s32.totalorder %s24_s30, 0  ;;  %p34_p9 = scmp.ne.s32.totalorder %s673_s20, %s669_s19 }
  0x25   : > { %p35_p1 = scmp.eq.s32.totalorder %s677_s21, 0  ;;  %p538_p4 = scmp.lt.s32.totalorder %s677_s21, 2 }
  0x26   : > { %s787_s18 = scalar_select %p25_p8, %s673_s20, %s27_s29  }
  0x27   : > { %p36_p5 = por %p35_p1, %p34_p9  ;;  %s200_s25 = sand.u32 1, %s673_s20  }
  0x28   : > { %s498_s6 = sshll.u32 %s200_s25, 3  ;;  %s499_s7 = sshll.u32 %s677_s21, 7 }
  0x29   : > { %s794_s10 = scalar_lea.hbm %s865_s0, %s499_s7  ;;  %s204_s26 = scalar_lea.vmem [#allocation2], %s498_s6 }
  0x2a   : > { %s211_s27 = sshll.u32 %s204_s26, 4  ;;  %p798_p7 = pnand %p538_p4, %p36_p5  ;;  %s796_s27 = int_to_ptr.vmem [resolvable:$true] %s211_s27 }
  0x2b   : > { %s201_s21 = scalar_lea.sflag [#allocation3], %s200_s25  ;;  %s609_s30 = scalar_lea.hbm %s794_s10, 128 }
  0x2c   : > { %p610_p10 = scmp.ne.s32.totalorder %s794_s10, %s609_s30  ;;  %p611_p11 = pneg %p798_p7 }
  0x2d   : > { %s614_s13 = scalar_lea.hbm %s865_s0, 256  ;;  %p615_p0 = scmp.lt.u32.totalorder %s794_s10, %s865_s0 }
  0x2e   : > { %p612_p12 = pnand %p611_p11, %p610_p10  ;;  %p616_p2 = scmp.lt.u32.totalorder %s614_s13, %s609_s30 }
  0x2f   : > { %p618_p6 = scmp.lt.u32.totalorder %s609_s30, %s794_s10 }
  0x30   : > { %p613_p13 = pneg %p612_p12  ;;  %p617_p3 = por %p616_p2, %p615_p0 }
  0x32   : > { %p619_p8 = por %p618_p6, %p617_p3 }
  0x34   : > { %p620_p9 = pnand %p619_p8, %p613_p13 }
  0x36   : > { %623 = shalt.err (!%p620_p9)
}
  0x37   : > { %s624_s16 = scalar_lea.vmem %s796_s27, 128  ;;  %s682_s17 = smov [#allocation2]  }
  0x38   : > { %p625_p1 = scmp.ne.s32.totalorder %s796_s27, %s624_s16  ;;  %s629_s25 = sshll.u32 %s682_s17, 4  ;;  %s630_s25 = int_to_ptr.vmem [resolvable:$false] %s629_s25 }
  0x39   : > { %s631_s6 = scalar_lea.vmem %s630_s25, 256  ;;  %p632_p10 = scmp.lt.s32.totalorder %s796_s27, %s630_s25 }
  0x3a   : > { %p627_p4 = pnand %p625_p1, %p611_p11  ;;  %p633_p12 = scmp.lt.s32.totalorder %s631_s6, %s624_s16 }
  0x3c   : > { %p628_p5 = pneg %p627_p4  ;;  %p634_p0 = por %p633_p12, %p632_p10 }
  0x3e   : > { %p635_p2 = pnand %p634_p0, %p628_p5 }
  0x40   : > { %638 = shalt.err (!%p635_p2)
}
  0x41   : > { %536 = dma.hbm_to_vmem [thread:$0]  (!%p798_p7), %s794_s10, 128, %s796_s27, %s201_s21  }
  0x42   : > { %p878_p13 = scmp.ne.s32.totalorder %s875_s24, 0 }
  0x43   : > { %s222_s7 = sand.u32 (!%p878_p13), 1, %s669_s19   ;;  %p879_p11 = scmp.ne.s32.totalorder (!%p878_p13), %s874_s23, 0 }
  0x44   : > { %220 = sbr.rel (%p878_p13) target bundleno = 422 (0x1a6), region = 32  ;;  %s501_s8 = sshll.u32 (!%p878_p13), %s222_s7, 3 }
  0x45   : > { %s223_s9 = scalar_lea.sflag (!%p878_p13), [#allocation3], %s222_s7  ;;  %s226_s26 = scalar_lea.vmem (!%p878_p13), [#allocation2], %s501_s8 }
  0x4b   : > { %656 = dma.done.wait (%p879_p11), %s223_s9, 128  }
  0x4c   : > { %658 = vsyncadd (%p879_p11), %s223_s9, 4294967168  ;;  %p880_p3 = scmp.eq.s32.totalorder %s736_s22, 0 }
  0x4e   : > { %660 = dma.done.wait (%p880_p3), [#allocation5], 256   ;;  %p881_p6 = pmov %p880_p3 }
  0x4f   : > { %v683_v0 = vmov 0.0   ;;  %vm684_vm0 = vmmov 0   ;;  %v579_v1 = vld [vmem:[#allocation4] sm:$0xff]   ;;  %v580_v2 = vld [vmem:[#allocation4 + $0x8] sm:$0xff]   ;;  %v277_v3 = vld [vmem:[%s226_s26] sm:$0xff]  ;;  %vm302_vm1 = vcmask 261120  }
  0x50   : > { %662 = vsyncadd (%p881_p6), [#allocation5], 4294967040  ;;  %515 = vmatprep.subr.bf16.mxu0 %v683_v0  ;;  %519 = vmatprep.mubr.msk.bf16.mxu0 %vm684_vm0, %v683_v0  ;;  %v278_v4 = vpack.c.bf16 %v277_v3, %v277_v3  ;;  %p264_p7 = scmp.lt.s32.totalorder %s736_s22, 1  ;;  %v506_v5 = vld [vmem:[%s867_s2] ss:$0 sm:$0xff]  ;;  %vm346_vm2 = vcmask 97280  }
  0x51   : > { %516 = vmatpush3.bf16.msra.mxu0 %v579_v1  ;;  %s685_s30 = smov 116   ;;  %s686_s11 = smov 104  }
  0x52   : > { %517 = vmatprep.subr.bf16.mxu0 %v683_v0  ;;  %s888_s22 = smov (!%p264_p7, %s736_s22), 1 }
  0x53   : > { %s503_s23 = sshll.u32 %s888_s22, 3 }
  0x54   : > { %s267_s21 = scalar_lea.vmem %s868_s3, %s503_s23  ;;  %s271_s13 = scalar_lea.vmem %s869_s4, %s503_s23 }
  0x55   : > { %518 = vmatpush3.bf16.msra.mxu0 %v580_v2  ;;  %s275_s16 = scalar_lea.vmem %s870_s5, %s503_s23 }
  0x58   : > { %520 = vmatmul.mubr.msk.bf16.vlgmr.msra.gmra.mrb[0].mxu0 %vm302_vm1, %v278_v4 }
 0x12b   : > { %v340_v6 = vpop.f32.mrb[0].mxu0 }
 0x12c   : > { %v341_v7 = vadd.f32 %v506_v5, %v340_v6  ;;  %v521_v8 = vpop.f32.mrb[1].mxu0 }
 0x12d   : > { %v343_v9 = vpop.f32.mrb[2].mxu0 }
 0x12e   : > { %349 = vrot.lane.b32.xlu0 %v341_v7, %s685_s30  ;;  %v522_v10 = vpop.f32.mrb[3].mxu0  ;;  %347 = vst.msk [vmem:[%s267_s21] sm:$0xff] %vm346_vm2, %v341_v7 }
 0x132   : > { %353 = vrot.lane.b32.xlu0 %v341_v7, %s686_s11 }
 0x1a0   : > { %v350_v11 = vpop.permute.xlu0 %349 }
 0x1a1   : > { %352 = vst.msk [vmem:[%s271_s13] sm:$0xff] %vm346_vm2, %v350_v11 }
 0x1a4   : > { %v354_v12 = vpop.permute.xlu0 %353 }
 0x1a5   : > { %356 = vst.msk [vmem:[%s275_s16] sm:$0xff] %vm346_vm2, %v354_v12 }
 0x1a6 PF: > { %s882_s17 = smov %s787_s18  ;;  %p17_p8 = scmp.ge.s32.totalorder %s761_s28, 4  }
 0x1a7   : > { %s883_s18 = smov %s669_s19  ;;  %s884_s19 = smov %s673_s20 }
 0x1a8   : > { %s885_s20 = smov %s882_s17  ;;  %s886_s21 = smov %s761_s28 }
 0x1a9   :  { %19 = sbr.rel (!%p17_p8) target bundleno = 4 (0x4), region = 100 }
 0x1b0   :  { %404 = vsyncpa [#allocation3], 1 }
 0x1b1   :  { %406 = vsyncpa [#allocation3 + $0x1], 1 }
 0x1b2   :  { %407 = vsyncpa [#allocation5], 1 }

</bundles_post_ra>
